<compile_context>
chip_gen: v6e
topology: v6e:2x2x1
jax: 0.10.0
libtpu: 0.0.40
codegen_flags: <defaults>
</compile_context>

<pallas_src>
import functools

import jax
import jax.numpy as jnp
from jax.experimental import pallas as pl
from jax.experimental.pallas import tpu as pltpu

LANES = 128     # TPU lane width  -> channel padding target
SUBLANES = 8    # f32 sublane cnt -> length padding target
BN_EPS = 1e-5


def _round_up(x, m):
    return (x + m - 1) // m * m


def _conv3_taps(h, w_ref, row, lp):
    """kernel_size=3, stride=1, padding=1 conv as three shifted MXU matmuls.

    h     : (Lp, Cp) channels-last activation; rows past the valid length must
            already be zero, so the shifted reads reproduce the conv's
            implicit zero padding.
    w_ref : (3, Cp, Cp) ref, tap k laid out as (Cin, Cout).
    row   : (Lp, 1) iota of row indices.
    """
    left = jnp.where(row >= 1, pltpu.roll(h, shift=1, axis=0), 0.0)        # h[l-1]
    right = jnp.where(row <= lp - 2, pltpu.roll(h, shift=lp - 1, axis=0),  # h[l+1]
                      0.0)
    y = jnp.dot(left, w_ref[0], preferred_element_type=jnp.float32)
    y += jnp.dot(h, w_ref[1], preferred_element_type=jnp.float32)
    y += jnp.dot(right, w_ref[2], preferred_element_type=jnp.float32)
    return y


def _basic_block_kernel(x_ref, w1_ref, s1_ref, b1_ref, w2_ref, s2_ref, b2_ref,
                        out_ref, *, l_valid):
    """Fused BasicBlock forward for one batch element.

    x_ref  : (Lp, Cp)  channels-last, zero padded past l_valid rows / C lanes
    w*_ref : (3, Cp, Cp)
    s*/b*  : (1, Cp)   folded BatchNorm scale / shift
    out_ref: (Lp, Cp)
    """
    lp = out_ref.shape[0]
    row = jax.lax.broadcasted_iota(jnp.int32, (lp, 1), 0)
    x = x_ref[...]                                          # (Lp, Cp)

    # conv1 -> bn1 -> relu
    y1 = _conv3_taps(x, w1_ref, row, lp)
    h1 = jnp.maximum(y1 * s1_ref[...] + b1_ref[...], 0.0)
    if lp > l_valid:
        # keep padded tail rows exactly zero so conv2's zero padding is exact
        h1 = jnp.where(row < l_valid, h1, 0.0)

    # conv2 -> bn2
    y2 = _conv3_taps(h1, w2_ref, row, lp)
    y2 = y2 * s2_ref[...] + b2_ref[...]

    # residual add + relu
    out_ref[...] = jnp.maximum(y2 + x, 0.0).astype(out_ref.dtype)


@jax.jit
def basic_block_forward(x, w1, g1, beta1, mean1, var1,
                        w2, g2, beta2, mean2, var2):
    """x: (B, C, L) like PyTorch Conv1d input; w*: (Cout, Cin, 3)."""
    B, C, L = x.shape
    Cp = _round_up(max(C, 1), LANES)
    Lp = _round_up(L, SUBLANES)
    dtype = jnp.float32

    # channels-last, zero padded to (Lp, Cp)
    xt = jnp.transpose(x, (0, 2, 1)).astype(dtype)               # (B, L, C)
    xp = jnp.zeros((B, Lp, Cp), dtype).at[:, :L, :C].set(xt)

    def pack_w(w):       # (Cout, Cin, 3) -> (3, Cin_p, Cout_p)
        wt = jnp.transpose(w, (2, 1, 0)).astype(dtype)           # (3, Cin, Cout)
        return jnp.zeros((3, Cp, Cp), dtype).at[:, :C, :C].set(wt)

    def pack_bn(g, b, m, v):
        scale = (g / jnp.sqrt(v + BN_EPS)).astype(dtype)
        shift = (b - m * scale).astype(dtype)
        s = jnp.zeros((1, Cp), dtype).at[0, :C].set(scale)
        t = jnp.zeros((1, Cp), dtype).at[0, :C].set(shift)
        return s, t

    w1p, w2p = pack_w(w1), pack_w(w2)
    s1, t1 = pack_bn(g1, beta1, mean1, var1)
    s2, t2 = pack_bn(g2, beta2, mean2, var2)

    kernel = pl.pallas_call(
        functools.partial(_basic_block_kernel, l_valid=L),
        out_shape=jax.ShapeDtypeStruct((B, Lp, Cp), dtype),
        grid_spec=pltpu.PrefetchScalarGridSpec(
            num_scalar_prefetch=0,
            grid=(B,),
            in_specs=[
                pl.BlockSpec((None, Lp, Cp), lambda b: (b, 0, 0)),   # x
                pl.BlockSpec((3, Cp, Cp), lambda b: (0, 0, 0)),      # w1
                pl.BlockSpec((1, Cp), lambda b: (0, 0)),             # bn1 scale
                pl.BlockSpec((1, Cp), lambda b: (0, 0)),             # bn1 shift
                pl.BlockSpec((3, Cp, Cp), lambda b: (0, 0, 0)),      # w2
                pl.BlockSpec((1, Cp), lambda b: (0, 0)),             # bn2 scale
                pl.BlockSpec((1, Cp), lambda b: (0, 0)),             # bn2 shift
            ],
            out_specs=pl.BlockSpec((None, Lp, Cp), lambda b: (b, 0, 0)),
        ),
        compiler_params=pltpu.CompilerParams(
            dimension_semantics=("parallel",)),
    )
    out = kernel(xp, w1p, s1, t1, w2p, s2, t2)                   # (B, Lp, Cp)
    return jnp.transpose(out[:, :L, :C], (0, 2, 1))              # (B, C, L)


# ----------------------------------------------------------------------------
# Pure-JAX reference (eval-mode BatchNorm, same math as the PyTorch block).
# ----------------------------------------------------------------------------
def _conv1d_k3(x, w):
    # x: (B, C, L); w: (Cout, Cin, 3); stride=1, padding=1, no bias
    L = x.shape[-1]
    xpad = jnp.pad(x, ((0, 0), (0, 0), (1, 1)))
    return sum(jnp.einsum("bcl,oc->bol", xpad[:, :, k:k + L], w[:, :, k])
               for k in range(3))


def _bn(x, g, b, m, v):
    inv = g / jnp.sqrt(v + BN_EPS)
    return x * inv[None, :, None] + (b - m * inv)[None, :, None]


def _reference_forward(x, w1, g1, b1, m1, v1, w2, g2, b2, m2, v2):
    out = jax.nn.relu(_bn(_conv1d_k3(x, w1), g1, b1, m1, v1))
    out = _bn(_conv1d_k3(out, w2), g2, b2, m2, v2)
    return jax.nn.relu(out + x)


if __name__ == "__main__":
    B, C, L = 2, 4, 16            # inplanes = planes = 4, stride=1, no downsample
    key = jax.random.PRNGKey(0)
    ks = jax.random.split(key, 11)

    x = jax.random.normal(ks[0], (B, C, L), jnp.float32)
    w1 = jax.random.normal(ks[1], (C, C, 3), jnp.float32) * 0.1
    w2 = jax.random.normal(ks[2], (C, C, 3), jnp.float32) * 0.1
    g1 = jax.random.uniform(ks[3], (C,), jnp.float32, 0.5, 1.5)
    b1 = jax.random.normal(ks[4], (C,), jnp.float32) * 0.1
    m1 = jax.random.normal(ks[5], (C,), jnp.float32) * 0.1
    v1 = jax.random.uniform(ks[6], (C,), jnp.float32, 0.5, 1.5)
    g2 = jax.random.uniform(ks[7], (C,), jnp.float32, 0.5, 1.5)
    b2 = jax.random.normal(ks[8], (C,), jnp.float32) * 0.1
    m2 = jax.random.normal(ks[9], (C,), jnp.float32) * 0.1
    v2 = jax.random.uniform(ks[10], (C,), jnp.float32, 0.5, 1.5)

    out = basic_block_forward(x, w1, g1, b1, m1, v1, w2, g2, b2, m2, v2)
    out = jax.block_until_ready(out)

    ref = _reference_forward(x, w1, g1, b1, m1, v1, w2, g2, b2, m2, v2)
    assert out.shape == (B, C, L), out.shape
    assert jnp.allclose(out, ref, atol=1e-4, rtol=1e-4), (out, ref)

    print("KERNEL_OK")
</pallas_src>

<mosaic_0001>
module attributes {stable_mosaic.version = 11 : i64} {
  func.func @_basic_block_kernel(%arg0: i32, %arg1: memref<1x16x128xf32, #tpu.memory_space<vmem>>, %arg2: memref<3x128x128xf32, #tpu.memory_space<vmem>>, %arg3: memref<1x128xf32, #tpu.memory_space<vmem>>, %arg4: memref<1x128xf32, #tpu.memory_space<vmem>>, %arg5: memref<3x128x128xf32, #tpu.memory_space<vmem>>, %arg6: memref<1x128xf32, #tpu.memory_space<vmem>>, %arg7: memref<1x128xf32, #tpu.memory_space<vmem>>, %arg8: memref<1x16x128xf32, #tpu.memory_space<vmem>>) attributes {dimension_semantics = [#tpu.dimension_semantics<parallel>], iteration_bounds = array<i64: 2>, scalar_prefetch = 0 : i64, scratch_operands = 0 : i64, tpu.core_type = #tpu.core_type<tc>, window_params = [{transform_indices = @transform_0, window_bounds = array<i64: 1, 16, 128>}, {pipeline_mode = #tpu.pipeline_mode<synchronous>, transform_indices = @transform_1, window_bounds = array<i64: 3, 128, 128>}, {pipeline_mode = #tpu.pipeline_mode<synchronous>, transform_indices = @transform_2, window_bounds = array<i64: 1, 128>}, {pipeline_mode = #tpu.pipeline_mode<synchronous>, transform_indices = @transform_3, window_bounds = array<i64: 1, 128>}, {pipeline_mode = #tpu.pipeline_mode<synchronous>, transform_indices = @transform_4, window_bounds = array<i64: 3, 128, 128>}, {pipeline_mode = #tpu.pipeline_mode<synchronous>, transform_indices = @transform_5, window_bounds = array<i64: 1, 128>}, {pipeline_mode = #tpu.pipeline_mode<synchronous>, transform_indices = @transform_6, window_bounds = array<i64: 1, 128>}, {transform_indices = @transform_7, window_bounds = array<i64: 1, 16, 128>}]} {
    %0 = tpu.iota {dimensions = array<i32: 0>} : vector<16x1xi32>
    %c0 = arith.constant 0 : index
    %c0_0 = arith.constant 0 : index
    %c0_1 = arith.constant 0 : index
    %1 = vector.load %arg1[%c0, %c0_0, %c0_1] : memref<1x16x128xf32, #tpu.memory_space<vmem>>, vector<1x16x128xf32>
    %2 = vector.shape_cast %1 : vector<1x16x128xf32> to vector<16x128xf32>
    %c1_i32 = arith.constant 1 : i32
    %3 = vector.broadcast %c1_i32 : i32 to vector<16x1xi32>
    %4 = arith.cmpi sge, %0, %3 : vector<16x1xi32>
    %c1_i32_2 = arith.constant 1 : i32
    %5 = tpu.dynamic_rotate %2 by %c1_i32_2 dim 0 : vector<16x128xf32>, i32 -> vector<16x128xf32>
    %cst = arith.constant 0.000000e+00 : f32
    %6 = vector.shape_cast %4 : vector<16x1xi1> to vector<16x1xi1>
    %7 = vector.broadcast %6 : vector<16x1xi1> to vector<16x128xi1>
    %8 = vector.broadcast %cst : f32 to vector<16x128xf32>
    %9 = arith.select %7, %5, %8 : vector<16x128xi1>, vector<16x128xf32>
    %c14_i32 = arith.constant 14 : i32
    %10 = vector.broadcast %c14_i32 : i32 to vector<16x1xi32>
    %11 = arith.cmpi sle, %0, %10 : vector<16x1xi32>
    %c15_i32 = arith.constant 15 : i32
    %12 = tpu.dynamic_rotate %2 by %c15_i32 dim 0 : vector<16x128xf32>, i32 -> vector<16x128xf32>
    %cst_3 = arith.constant 0.000000e+00 : f32
    %13 = vector.shape_cast %11 : vector<16x1xi1> to vector<16x1xi1>
    %14 = vector.broadcast %13 : vector<16x1xi1> to vector<16x128xi1>
    %15 = vector.broadcast %cst_3 : f32 to vector<16x128xf32>
    %16 = arith.select %14, %12, %15 : vector<16x128xi1>, vector<16x128xf32>
    %c0_4 = arith.constant 0 : index
    %c0_5 = arith.constant 0 : index
    %c0_6 = arith.constant 0 : index
    %17 = vector.load %arg2[%c0_4, %c0_5, %c0_6] : memref<3x128x128xf32, #tpu.memory_space<vmem>>, vector<1x128x128xf32>
    %18 = vector.shape_cast %17 : vector<1x128x128xf32> to vector<128x128xf32>
    %cst_7 = arith.constant dense<0.000000e+00> : vector<16x128xf32>
    %19 = tpu.matmul %9, %18, %cst_7 {dimension_numbers = #tpu.dot_dimension_numbers<[1], [0], [0], [1], [0, 0, 1, 1], [], []>} : vector<16x128xf32>, vector<128x128xf32>, vector<16x128xf32> -> vector<16x128xf32>
    %c1 = arith.constant 1 : index
    %c0_8 = arith.constant 0 : index
    %c0_9 = arith.constant 0 : index
    %20 = vector.load %arg2[%c1, %c0_8, %c0_9] : memref<3x128x128xf32, #tpu.memory_space<vmem>>, vector<1x128x128xf32>
    %21 = vector.shape_cast %20 : vector<1x128x128xf32> to vector<128x128xf32>
    %cst_10 = arith.constant dense<0.000000e+00> : vector<16x128xf32>
    %22 = tpu.matmul %2, %21, %cst_10 {dimension_numbers = #tpu.dot_dimension_numbers<[1], [0], [0], [1], [0, 0, 1, 1], [], []>} : vector<16x128xf32>, vector<128x128xf32>, vector<16x128xf32> -> vector<16x128xf32>
    %23 = arith.addf %19, %22 : vector<16x128xf32>
    %c2 = arith.constant 2 : index
    %c0_11 = arith.constant 0 : index
    %c0_12 = arith.constant 0 : index
    %24 = vector.load %arg2[%c2, %c0_11, %c0_12] : memref<3x128x128xf32, #tpu.memory_space<vmem>>, vector<1x128x128xf32>
    %25 = vector.shape_cast %24 : vector<1x128x128xf32> to vector<128x128xf32>
    %cst_13 = arith.constant dense<0.000000e+00> : vector<16x128xf32>
    %26 = tpu.matmul %16, %25, %cst_13 {dimension_numbers = #tpu.dot_dimension_numbers<[1], [0], [0], [1], [0, 0, 1, 1], [], []>} : vector<16x128xf32>, vector<128x128xf32>, vector<16x128xf32> -> vector<16x128xf32>
    %27 = arith.addf %23, %26 : vector<16x128xf32>
    %c0_14 = arith.constant 0 : index
    %c0_15 = arith.constant 0 : index
    %28 = vector.load %arg3[%c0_14, %c0_15] : memref<1x128xf32, #tpu.memory_space<vmem>>, vector<1x128xf32>
    %29 = vector.broadcast %28 : vector<1x128xf32> to vector<16x128xf32>
    %30 = arith.mulf %27, %29 : vector<16x128xf32>
    %c0_16 = arith.constant 0 : index
    %c0_17 = arith.constant 0 : index
    %31 = vector.load %arg4[%c0_16, %c0_17] : memref<1x128xf32, #tpu.memory_space<vmem>>, vector<1x128xf32>
    %32 = vector.broadcast %31 : vector<1x128xf32> to vector<16x128xf32>
    %33 = arith.addf %30, %32 : vector<16x128xf32>
    %cst_18 = arith.constant 0.000000e+00 : f32
    %34 = vector.broadcast %cst_18 : f32 to vector<16x128xf32>
    %35 = arith.maximumf %33, %34 : vector<16x128xf32>
    %c1_i32_19 = arith.constant 1 : i32
    %36 = vector.broadcast %c1_i32_19 : i32 to vector<16x1xi32>
    %37 = arith.cmpi sge, %0, %36 : vector<16x1xi32>
    %c1_i32_20 = arith.constant 1 : i32
    %38 = tpu.dynamic_rotate %35 by %c1_i32_20 dim 0 : vector<16x128xf32>, i32 -> vector<16x128xf32>
    %cst_21 = arith.constant 0.000000e+00 : f32
    %39 = vector.shape_cast %37 : vector<16x1xi1> to vector<16x1xi1>
    %40 = vector.broadcast %39 : vector<16x1xi1> to vector<16x128xi1>
    %41 = vector.broadcast %cst_21 : f32 to vector<16x128xf32>
    %42 = arith.select %40, %38, %41 : vector<16x128xi1>, vector<16x128xf32>
    %c14_i32_22 = arith.constant 14 : i32
    %43 = vector.broadcast %c14_i32_22 : i32 to vector<16x1xi32>
    %44 = arith.cmpi sle, %0, %43 : vector<16x1xi32>
    %c15_i32_23 = arith.constant 15 : i32
    %45 = tpu.dynamic_rotate %35 by %c15_i32_23 dim 0 : vector<16x128xf32>, i32 -> vector<16x128xf32>
    %cst_24 = arith.constant 0.000000e+00 : f32
    %46 = vector.shape_cast %44 : vector<16x1xi1> to vector<16x1xi1>
    %47 = vector.broadcast %46 : vector<16x1xi1> to vector<16x128xi1>
    %48 = vector.broadcast %cst_24 : f32 to vector<16x128xf32>
    %49 = arith.select %47, %45, %48 : vector<16x128xi1>, vector<16x128xf32>
    %c0_25 = arith.constant 0 : index
    %c0_26 = arith.constant 0 : index
    %c0_27 = arith.constant 0 : index
    %50 = vector.load %arg5[%c0_25, %c0_26, %c0_27] : memref<3x128x128xf32, #tpu.memory_space<vmem>>, vector<1x128x128xf32>
    %51 = vector.shape_cast %50 : vector<1x128x128xf32> to vector<128x128xf32>
    %cst_28 = arith.constant dense<0.000000e+00> : vector<16x128xf32>
    %52 = tpu.matmul %42, %51, %cst_28 {dimension_numbers = #tpu.dot_dimension_numbers<[1], [0], [0], [1], [0, 0, 1, 1], [], []>} : vector<16x128xf32>, vector<128x128xf32>, vector<16x128xf32> -> vector<16x128xf32>
    %c1_29 = arith.constant 1 : index
    %c0_30 = arith.constant 0 : index
    %c0_31 = arith.constant 0 : index
    %53 = vector.load %arg5[%c1_29, %c0_30, %c0_31] : memref<3x128x128xf32, #tpu.memory_space<vmem>>, vector<1x128x128xf32>
    %54 = vector.shape_cast %53 : vector<1x128x128xf32> to vector<128x128xf32>
    %cst_32 = arith.constant dense<0.000000e+00> : vector<16x128xf32>
    %55 = tpu.matmul %35, %54, %cst_32 {dimension_numbers = #tpu.dot_dimension_numbers<[1], [0], [0], [1], [0, 0, 1, 1], [], []>} : vector<16x128xf32>, vector<128x128xf32>, vector<16x128xf32> -> vector<16x128xf32>
    %56 = arith.addf %52, %55 : vector<16x128xf32>
    %c2_33 = arith.constant 2 : index
    %c0_34 = arith.constant 0 : index
    %c0_35 = arith.constant 0 : index
    %57 = vector.load %arg5[%c2_33, %c0_34, %c0_35] : memref<3x128x128xf32, #tpu.memory_space<vmem>>, vector<1x128x128xf32>
    %58 = vector.shape_cast %57 : vector<1x128x128xf32> to vector<128x128xf32>
    %cst_36 = arith.constant dense<0.000000e+00> : vector<16x128xf32>
    %59 = tpu.matmul %49, %58, %cst_36 {dimension_numbers = #tpu.dot_dimension_numbers<[1], [0], [0], [1], [0, 0, 1, 1], [], []>} : vector<16x128xf32>, vector<128x128xf32>, vector<16x128xf32> -> vector<16x128xf32>
    %60 = arith.addf %56, %59 : vector<16x128xf32>
    %c0_37 = arith.constant 0 : index
    %c0_38 = arith.constant 0 : index
    %61 = vector.load %arg6[%c0_37, %c0_38] : memref<1x128xf32, #tpu.memory_space<vmem>>, vector<1x128xf32>
    %62 = vector.broadcast %61 : vector<1x128xf32> to vector<16x128xf32>
    %63 = arith.mulf %60, %62 : vector<16x128xf32>
    %c0_39 = arith.constant 0 : index
    %c0_40 = arith.constant 0 : index
    %64 = vector.load %arg7[%c0_39, %c0_40] : memref<1x128xf32, #tpu.memory_space<vmem>>, vector<1x128xf32>
    %65 = vector.broadcast %64 : vector<1x128xf32> to vector<16x128xf32>
    %66 = arith.addf %63, %65 : vector<16x128xf32>
    %67 = arith.addf %66, %2 : vector<16x128xf32>
    %cst_41 = arith.constant 0.000000e+00 : f32
    %68 = vector.broadcast %cst_41 : f32 to vector<16x128xf32>
    %69 = arith.maximumf %67, %68 : vector<16x128xf32>
    %c0_42 = arith.constant 0 : index
    %c0_43 = arith.constant 0 : index
    %c0_44 = arith.constant 0 : index
    %70 = vector.load %arg8[%c0_42, %c0_43, %c0_44] : memref<1x16x128xf32, #tpu.memory_space<vmem>>, vector<1x16x128xf32>
    %71 = vector.shape_cast %70 : vector<1x16x128xf32> to vector<16x128xf32>
    %72 = vector.shape_cast %69 : vector<16x128xf32> to vector<1x16x128xf32>
    tpu.vector_store %arg8[%c0_42, %c0_43, %c0_44], %72 {strides = array<i32>} : memref<1x16x128xf32, #tpu.memory_space<vmem>>, vector<1x16x128xf32>,
    return
  }
  func.func @transform_0(%arg0: i32) -> (i32, i32, i32) {
    %c0_i32 = arith.constant 0 : i32
    %c0_i32_0 = arith.constant 0 : i32
    %c0_i32_1 = arith.constant 0 : i32
    return %arg0, %c0_i32, %c0_i32_0 : i32, i32, i32
  }
  func.func @transform_1(%arg0: i32) -> (i32, i32, i32) {
    %c0_i32 = arith.constant 0 : i32
    %c0_i32_0 = arith.constant 0 : i32
    %c0_i32_1 = arith.constant 0 : i32
    %c0_i32_2 = arith.constant 0 : i32
    return %c0_i32, %c0_i32_0, %c0_i32_1 : i32, i32, i32
  }
  func.func @transform_2(%arg0: i32) -> (i32, i32) {
    %c0_i32 = arith.constant 0 : i32
    %c0_i32_0 = arith.constant 0 : i32
    %c0_i32_1 = arith.constant 0 : i32
    return %c0_i32, %c0_i32_0 : i32, i32
  }
  func.func @transform_3(%arg0: i32) -> (i32, i32) {
    %c0_i32 = arith.constant 0 : i32
    %c0_i32_0 = arith.constant 0 : i32
    %c0_i32_1 = arith.constant 0 : i32
    return %c0_i32, %c0_i32_0 : i32, i32
  }
  func.func @transform_4(%arg0: i32) -> (i32, i32, i32) {
    %c0_i32 = arith.constant 0 : i32
    %c0_i32_0 = arith.constant 0 : i32
    %c0_i32_1 = arith.constant 0 : i32
    %c0_i32_2 = arith.constant 0 : i32
    return %c0_i32, %c0_i32_0, %c0_i32_1 : i32, i32, i32
  }
  func.func @transform_5(%arg0: i32) -> (i32, i32) {
    %c0_i32 = arith.constant 0 : i32
    %c0_i32_0 = arith.constant 0 : i32
    %c0_i32_1 = arith.constant 0 : i32
    return %c0_i32, %c0_i32_0 : i32, i32
  }
  func.func @transform_6(%arg0: i32) -> (i32, i32) {
    %c0_i32 = arith.constant 0 : i32
    %c0_i32_0 = arith.constant 0 : i32
    %c0_i32_1 = arith.constant 0 : i32
    return %c0_i32, %c0_i32_0 : i32, i32
  }
  func.func @transform_7(%arg0: i32) -> (i32, i32, i32) {
    %c0_i32 = arith.constant 0 : i32
    %c0_i32_0 = arith.constant 0 : i32
    %c0_i32_1 = arith.constant 0 : i32
    return %arg0, %c0_i32, %c0_i32_0 : i32, i32, i32
  }
}

</mosaic_0001>

<bundles_post_ra>
// kernel: basic_block_forward.1
= control target key start
LH: loop header
LB: loop body
LE: loop exit
PB: predicated region body
PF: predicated region fallthrough
CT: control target
= control target key end

     0   :  { %s1434_s24 = smov 0   ;;  %s1820_s0 = inlined_call_operand.vmem [shape: f32[2,16,128], index: 0, kind: input, shape index: {}]   ;;  %s1821_s1 = inlined_call_operand.vmem [shape: f32[3,128,128], index: 1, kind: input, shape index: {}]   ;;  %s1822_s2 = inlined_call_operand.vmem [shape: f32[1,128], index: 2, kind: input, shape index: {}]   ;;  %s1823_s3 = inlined_call_operand.vmem [shape: f32[1,128], index: 3, kind: input, shape index: {}]   ;;  %s1824_s4 = inlined_call_operand.vmem [shape: f32[3,128,128], index: 4, kind: input, shape index: {}]   ;;  %s1825_s5 = inlined_call_operand.vmem [shape: f32[1,128], index: 5, kind: input, shape index: {}]   ;;  %s1826_s6 = inlined_call_operand.vmem [shape: f32[1,128], index: 6, kind: input, shape index: {}]   ;;  %s1827_s7 = inlined_call_operand.vmem [shape: f32[2,16,128], index: 7, kind: output, shape index: {}]  }
   0x1 LB: > { %s975_s25 = sadd.s32 4294967295, %s1392_s24   ;;  %p979_p0 = scmp.ge.s32.totalorder %s1392_s24, 1  ;;  %s1392_s24 = sphi %s1434_s24, %s17_s24  }
   0x2   : > { %p237_p1 = scmp.lt.s32.totalorder %s1392_s24, 3 }
   0x4   : > { %p238_p2 = pnand %p979_p0, %p237_p1 }
   0x5   : > { %p269_p3 = scmp.lt.s32.totalorder (!%p238_p2), %s975_s25, 1 }
   0x6   : > { %241 = sbr.rel (%p238_p2) target bundleno = 520 (0x208), region = 48 }
   0xb   : > { %v999_v0 = vld [vmem:[%s1821_s1 + $0xf8] sm:$0xff]  ;;  %v998_v2 = vld [vmem:[%s1821_s1 + $0xf0] sm:$0xff]  ;;  %v997_v4 = vld [vmem:[%s1821_s1 + $0xe8] sm:$0xff]  ;;  %s1829_s25 = smov (!%p269_p3, %s975_s25), 1  ;;  %v279_v22 = vlaneseq }
   0xc   : > { %v325_v1 = vld [vmem:[%s1821_s1 + $0x78] sm:$0xff]  ;;  %1168 = vmatprep.subr.mxu0 %v999_v0  ;;  %v324_v3 = vld [vmem:[%s1821_s1 + $0x70] sm:$0xff]  ;;  %v323_v5 = vld [vmem:[%s1821_s1 + $0x68] sm:$0xff]  ;;  %s1058_s22 = sshll.u32 %s1829_s25, 4 }
   0xd   : > { %1203 = vmatprep.subr.mxu1 %v325_v1  ;;  %1169 = vmatpush3.msra.mxu0 %v999_v0  ;;  %v996_v6 = vld [vmem:[%s1821_s1 + $0xe0] sm:$0xff]  ;;  %v995_v8 = vld [vmem:[%s1821_s1 + $0xd8] sm:$0xff]  ;;  %v994_v10 = vld [vmem:[%s1821_s1 + $0xd0] sm:$0xff]  ;;  %s273_s12 = scalar_lea.vmem %s1820_s0, %s1058_s22  ;;  %v1536_v29 = vshrl.u32 %v279_v22, 7  ;;  %s278_s30 = scalar_lea.vmem %s1827_s7, %s1058_s22 }
   0xe   : > { %1204 = vmatpush3.msra.mxu1 %v325_v1  ;;  %1170 = vmatprep.subr.mxu0 %v998_v2  ;;  %v322_v7 = vld [vmem:[%s1821_s1 + $0x60] sm:$0xff]  ;;  %v321_v9 = vld [vmem:[%s1821_s1 + $0x58] sm:$0xff]  ;;  %v320_v11 = vld [vmem:[%s1821_s1 + $0x50] sm:$0xff] }
   0xf   : > { %1205 = vmatprep.subr.mxu1 %v324_v3  ;;  %1171 = vmatpush3.msra.mxu0 %v998_v2  ;;  %v993_v12 = vld [vmem:[%s1821_s1 + $0xc8] sm:$0xff]  ;;  %v992_v14 = vld [vmem:[%s1821_s1 + $0xc0] sm:$0xff]  ;;  %v991_v16 = vld [vmem:[%s1821_s1 + $0xb8] sm:$0xff]  ;;  %vm288_vm0 = vcmp.lt.s32.totalorder %v1536_v29, 1  ;;  %vm301_vm1 = vcmp.lt.s32.totalorder %v1536_v29, 7  ;;  %vm284_vm2 = vcmp.ge.s32.totalorder %v1536_v29, 1 }
  0x10   : > { %1206 = vmatpush3.msra.mxu1 %v324_v3  ;;  %1172 = vmatprep.subr.mxu0 %v997_v4  ;;  %v319_v13 = vld [vmem:[%s1821_s1 + $0x48] sm:$0xff]  ;;  %v318_v15 = vld [vmem:[%s1821_s1 + $0x40] sm:$0xff]  ;;  %v317_v17 = vld [vmem:[%s1821_s1 + $0x38] sm:$0xff]  ;;  %v1623_v58 = vadd.s32 8, %v1536_v29 }
  0x11   : > { %1207 = vmatprep.subr.mxu1 %v323_v5  ;;  %1173 = vmatpush3.msra.mxu0 %v997_v4  ;;  %v990_v18 = vld [vmem:[%s1821_s1 + $0xb0] sm:$0xff]  ;;  %v989_v20 = vld [vmem:[%s1821_s1 + $0xa8] sm:$0xff]  ;;  %v988_v23 = vld [vmem:[%s1821_s1 + $0xa0] sm:$0xff] }
  0x12   : > { %1208 = vmatpush3.msra.mxu1 %v323_v5  ;;  %1174 = vmatprep.subr.mxu0 %v996_v6  ;;  %v316_v19 = vld [vmem:[%s1821_s1 + $0x30] sm:$0xff]  ;;  %v315_v21 = vld [vmem:[%s1821_s1 + $0x28] sm:$0xff]  ;;  %v314_v24 = vld [vmem:[%s1821_s1 + $0x20] sm:$0xff]  ;;  %vm298_vm3 = vcmp.le.s32.totalorder %v1623_v58, 14 }
  0x13   : > { %1209 = vmatprep.subr.mxu1 %v322_v7  ;;  %1175 = vmatpush3.msra.mxu0 %v996_v6  ;;  %v987_v25 = vld [vmem:[%s1821_s1 + $0x98] sm:$0xff]  ;;  %v1532_v27 = vld [vmem:[%s273_s12] sm:$0xff]  ;;  %v1534_v28 = vld [vmem:[%s273_s12 + $0x8] sm:$0xff] }
  0x14   : > { %1210 = vmatpush3.msra.mxu1 %v322_v7  ;;  %1176 = vmatprep.subr.mxu0 %v995_v8  ;;  %v313_v26 = vld [vmem:[%s1821_s1 + $0x18] sm:$0xff]  ;;  %v986_v30 = vld [vmem:[%s1821_s1 + $0x90] sm:$0xff]  ;;  %v985_v32 = vld [vmem:[%s1821_s1 + $0x88] sm:$0xff]  ;;  %v286_v34 = vrot.slane %v1532_v27, 7  ;;  %v287_v35 = vrot.slane %v1534_v28, 7  ;;  %v299_v38 = vrot.slane %v1532_v27, 1 }
  0x15   : > { %1211 = vmatprep.subr.mxu1 %v321_v9  ;;  %1177 = vmatpush3.msra.mxu0 %v995_v8  ;;  %v312_v31 = vld [vmem:[%s1821_s1 + $0x10] sm:$0xff]  ;;  %v311_v33 = vld [vmem:[%s1821_s1 + $0x8] sm:$0xff]  ;;  %v984_v36 = vld [vmem:[%s1821_s1 + $0x80] sm:$0xff]  ;;  %v300_v39 = vrot.slane %v1534_v28, 1 }
  0x16   : > { %1212 = vmatpush3.msra.mxu1 %v321_v9  ;;  %1178 = vmatprep.subr.mxu0 %v994_v10  ;;  %v310_v37 = vld [vmem:[%s1821_s1] sm:$0xff]  ;;  %v290_v40 = vsel %vm288_vm0, %v287_v35, %v286_v34  ;;  %v289_v41 = vsel %vm288_vm0, %v286_v34, %v287_v35  ;;  %v1016_v42 = vld [vmem:[%s1821_s1 + $0x178] sm:$0xff]  ;;  %v1015_v44 = vld [vmem:[%s1821_s1 + $0x170] sm:$0xff] }
  0x17   : > { %1213 = vmatprep.subr.mxu1 %v320_v11  ;;  %1179 = vmatpush3.msra.mxu0 %v994_v10  ;;  %v302_v43 = vsel %vm301_vm1, %v299_v38, %v300_v39  ;;  %v1014_v45 = vld [vmem:[%s1821_s1 + $0x168] sm:$0xff]  ;;  %v1013_v46 = vld [vmem:[%s1821_s1 + $0x160] sm:$0xff]  ;;  %v1012_v47 = vld [vmem:[%s1821_s1 + $0x158] sm:$0xff]  ;;  %v303_v60 = vsel %vm301_vm1, %v300_v39, %v299_v38 }
  0x18   : > { %1214 = vmatpush3.msra.mxu1 %v320_v11  ;;  %1180 = vmatprep.subr.mxu0 %v993_v12  ;;  %v1011_v48 = vld [vmem:[%s1821_s1 + $0x150] sm:$0xff]  ;;  %v1010_v49 = vld [vmem:[%s1821_s1 + $0x148] sm:$0xff]  ;;  %v1009_v50 = vld [vmem:[%s1821_s1 + $0x140] sm:$0xff] }
  0x19   : > { %1215 = vmatprep.subr.mxu1 %v319_v13  ;;  %1181 = vmatpush3.msra.mxu0 %v993_v12  ;;  %v1008_v51 = vld [vmem:[%s1821_s1 + $0x138] sm:$0xff]  ;;  %v1007_v52 = vld [vmem:[%s1821_s1 + $0x130] sm:$0xff]  ;;  %v1006_v53 = vld [vmem:[%s1821_s1 + $0x128] sm:$0xff] }
  0x1a   : > { %1216 = vmatpush3.msra.mxu1 %v319_v13  ;;  %1182 = vmatprep.subr.mxu0 %v992_v14  ;;  %v1005_v54 = vld [vmem:[%s1821_s1 + $0x120] sm:$0xff]  ;;  %v1004_v55 = vld [vmem:[%s1821_s1 + $0x118] sm:$0xff]  ;;  %v1003_v56 = vld [vmem:[%s1821_s1 + $0x110] sm:$0xff] }
  0x1b   : > { %1217 = vmatprep.subr.mxu1 %v318_v15  ;;  %1183 = vmatpush3.msra.mxu0 %v992_v14  ;;  %v1002_v57 = vld [vmem:[%s1821_s1 + $0x108] sm:$0xff]  ;;  %v1001_v59 = vld [vmem:[%s1821_s1 + $0x100] sm:$0xff]  ;;  %v1035_v61 = vld [vmem:[%s1824_s4 + $0xf8] sm:$0xff] }
  0x1c   : > { %1218 = vmatpush3.msra.mxu1 %v318_v15  ;;  %1184 = vmatprep.subr.mxu0 %v991_v16  ;;  %v1034_v62 = vld [vmem:[%s1824_s4 + $0xf0] sm:$0xff]  ;;  %v634_v63 = vld [vmem:[%s1824_s4 + $0x78] sm:$0xff]  ;;  %v1033_v1 = vld [vmem:[%s1824_s4 + $0xe8] sm:$0xff] }
  0x1d   : > { %1219 = vmatprep.subr.mxu1 %v317_v17  ;;  %1185 = vmatpush3.msra.mxu0 %v991_v16  ;;  %v633_v0 = vld [vmem:[%s1824_s4 + $0x70] sm:$0xff]  ;;  %v632_v2 = vld [vmem:[%s1824_s4 + $0x68] sm:$0xff]  ;;  %v1032_v3 = vld [vmem:[%s1824_s4 + $0xe0] sm:$0xff] }
  0x1e   : > { %1220 = vmatpush3.msra.mxu1 %v317_v17  ;;  %1186 = vmatprep.subr.mxu0 %v990_v18  ;;  %v631_v4 = vld [vmem:[%s1824_s4 + $0x60] sm:$0xff]  ;;  %v1031_v5 = vld [vmem:[%s1824_s4 + $0xd8] sm:$0xff]  ;;  %v1030_v7 = vld [vmem:[%s1824_s4 + $0xd0] sm:$0xff] }
  0x1f   : > { %1221 = vmatprep.subr.mxu1 %v316_v19  ;;  %1187 = vmatpush3.msra.mxu0 %v990_v18  ;;  %v630_v6 = vld [vmem:[%s1824_s4 + $0x58] sm:$0xff]  ;;  %v629_v8 = vld [vmem:[%s1824_s4 + $0x50] sm:$0xff]  ;;  %v1029_v9 = vld [vmem:[%s1824_s4 + $0xc8] sm:$0xff] }
  0x20   : > { %1222 = vmatpush3.msra.mxu1 %v316_v19  ;;  %1188 = vmatprep.subr.mxu0 %v989_v20  ;;  %v628_v10 = vld [vmem:[%s1824_s4 + $0x48] sm:$0xff]  ;;  %v1028_v11 = vld [vmem:[%s1824_s4 + $0xc0] sm:$0xff]  ;;  %v1027_v13 = vld [vmem:[%s1824_s4 + $0xb8] sm:$0xff] }
  0x21   : > { %1223 = vmatprep.subr.mxu1 %v315_v21  ;;  %1189 = vmatpush3.msra.mxu0 %v989_v20  ;;  %v627_v12 = vld [vmem:[%s1824_s4 + $0x40] sm:$0xff]  ;;  %v626_v14 = vld [vmem:[%s1824_s4 + $0x38] sm:$0xff]  ;;  %v1026_v15 = vld [vmem:[%s1824_s4 + $0xb0] sm:$0xff] }
  0x22   : > { %1224 = vmatpush3.msra.mxu1 %v315_v21  ;;  %1190 = vmatprep.subr.mxu0 %v988_v23  ;;  %v1025_v16 = vld [vmem:[%s1824_s4 + $0xa8] sm:$0xff]  ;;  %v1024_v17 = vld [vmem:[%s1824_s4 + $0xa0] sm:$0xff]  ;;  %v625_v18 = vld [vmem:[%s1824_s4 + $0x30] sm:$0xff] }
  0x23   : > { %1225 = vmatprep.subr.mxu1 %v314_v24  ;;  %1191 = vmatpush3.msra.mxu0 %v988_v23  ;;  %v1023_v19 = vld [vmem:[%s1824_s4 + $0x98] sm:$0xff]  ;;  %v624_v20 = vld [vmem:[%s1824_s4 + $0x28] sm:$0xff]  ;;  %v1022_v21 = vld [vmem:[%s1824_s4 + $0x90] sm:$0xff] }
  0x24   : > { %1226 = vmatpush3.msra.mxu1 %v314_v24  ;;  %1192 = vmatprep.subr.mxu0 %v987_v25  ;;  %v623_v22 = vld [vmem:[%s1824_s4 + $0x20] sm:$0xff]  ;;  %v1021_v23 = vld [vmem:[%s1824_s4 + $0x88] sm:$0xff]  ;;  %v622_v24 = vld [vmem:[%s1824_s4 + $0x18] sm:$0xff] }
  0x25   : > { %1227 = vmatprep.subr.mxu1 %v313_v26  ;;  %1193 = vmatpush3.msra.mxu0 %v987_v25  ;;  %v1020_v25 = vld [vmem:[%s1824_s4 + $0x80] sm:$0xff] }
  0x26   : > { %1228 = vmatpush3.msra.mxu1 %v313_v26  ;;  %1194 = vmatprep.subr.mxu0 %v986_v30  ;;  %v621_v26 = vld [vmem:[%s1824_s4 + $0x10] sm:$0xff]  ;;  %v1018_v39 = vld [vmem:[%s1822_s2] ss:$0 sm:$0xff] }
  0x27   : > { %1229 = vmatprep.subr.mxu1 %v312_v31  ;;  %1195 = vmatpush3.msra.mxu0 %v986_v30  ;;  %v620_v30 = vld [vmem:[%s1824_s4 + $0x8] sm:$0xff]  ;;  %v1055_v29 = vld [vmem:[%s1826_s6] ss:$0 sm:$0xff] }
  0x28   : > { %1230 = vmatpush3.msra.mxu1 %v312_v31  ;;  %1196 = vmatprep.subr.mxu0 %v985_v32  ;;  %v1052_v31 = vld [vmem:[%s1824_s4 + $0x178] sm:$0xff] }
  0x29   : > { %1231 = vmatprep.subr.mxu1 %v311_v33  ;;  %1197 = vmatpush3.msra.mxu0 %v985_v32  ;;  %v619_v32 = vld [vmem:[%s1824_s4] sm:$0xff] }
  0x2a   : > { %1232 = vmatpush3.msra.mxu1 %v311_v33  ;;  %1198 = vmatprep.subr.mxu0 %v984_v36 }
  0x2b   : > { %1233 = vmatprep.subr.mxu1 %v310_v37  ;;  %1199 = vmatpush3.msra.mxu0 %v984_v36 }
  0x2c   : > { %1200 = vmatprep.mubr.f32.mxu0 %v1532_v27  ;;  %1234 = vmatpush3.msra.mxu1 %v310_v37 }
  0x2d   : > { %1235 = vmatprep.mubr.msk.f32.mxu1 %vm284_vm2, %v290_v40  ;;  %1201 = vmatmul.mubr.f32.vlgmr.msra.gmra.mxu0 %v1534_v28 }
  0x2e   : > { %1236 = vmatmul.mubr.f32.vlgmr.msra.gmra.mxu1 %v289_v41  ;;  %1238 = vmatprep.subr.mxu0 %v1016_v42 }
  0x2f   : > { %1270 = vmatprep.mubr.f32.mxu0 %v302_v43  ;;  %1239 = vmatpush3.msra.mxu0 %v1016_v42  ;;  %v1019_v42 = vld [vmem:[%s1823_s3] ss:$0 sm:$0xff] }
  0x30   : > { %1240 = vmatprep.subr.mxu0 %v1015_v44  ;;  %1273 = vmatprep.subr.mxu1 %v1035_v61 }
  0x31   : > { %1241 = vmatpush3.msra.mxu0 %v1015_v44  ;;  %1274 = vmatpush3.msra.mxu1 %v1035_v61  ;;  %v1049_v61 = vld [vmem:[%s1824_s4 + $0x160] sm:$0xff] }
  0x32   : > { %1242 = vmatprep.subr.mxu0 %v1014_v45  ;;  %1275 = vmatprep.subr.mxu1 %v1034_v62 }
  0x33   : > { %1243 = vmatpush3.msra.mxu0 %v1014_v45  ;;  %1276 = vmatpush3.msra.mxu1 %v1034_v62  ;;  %v1048_v62 = vld [vmem:[%s1824_s4 + $0x158] sm:$0xff] }
  0x34   : > { %1244 = vmatprep.subr.mxu0 %v1013_v46  ;;  %1277 = vmatprep.subr.mxu1 %v1033_v1 }
  0x35   : > { %1245 = vmatpush3.msra.mxu0 %v1013_v46  ;;  %1278 = vmatpush3.msra.mxu1 %v1033_v1  ;;  %v1045_v1 = vld [vmem:[%s1824_s4 + $0x140] sm:$0xff] }
  0x36   : > { %1246 = vmatprep.subr.mxu0 %v1012_v47  ;;  %1279 = vmatprep.subr.mxu1 %v1032_v3 }
  0x37   : > { %1247 = vmatpush3.msra.mxu0 %v1012_v47  ;;  %1280 = vmatpush3.msra.mxu1 %v1032_v3  ;;  %v1043_v3 = vld [vmem:[%s1824_s4 + $0x130] sm:$0xff] }
  0x38   : > { %1248 = vmatprep.subr.mxu0 %v1011_v48  ;;  %1281 = vmatprep.subr.mxu1 %v1031_v5 }
  0x39   : > { %1249 = vmatpush3.msra.mxu0 %v1011_v48  ;;  %1282 = vmatpush3.msra.mxu1 %v1031_v5  ;;  %v1041_v5 = vld [vmem:[%s1824_s4 + $0x120] sm:$0xff] }
  0x3a   : > { %1250 = vmatprep.subr.mxu0 %v1010_v49  ;;  %1283 = vmatprep.subr.mxu1 %v1030_v7 }
  0x3b   : > { %1251 = vmatpush3.msra.mxu0 %v1010_v49  ;;  %1284 = vmatpush3.msra.mxu1 %v1030_v7  ;;  %v1039_v7 = vld [vmem:[%s1824_s4 + $0x110] sm:$0xff] }
  0x3c   : > { %1252 = vmatprep.subr.mxu0 %v1009_v50  ;;  %1285 = vmatprep.subr.mxu1 %v1029_v9 }
  0x3d   : > { %1253 = vmatpush3.msra.mxu0 %v1009_v50  ;;  %1286 = vmatpush3.msra.mxu1 %v1029_v9  ;;  %v1037_v9 = vld [vmem:[%s1824_s4 + $0x100] sm:$0xff] }
  0x3e   : > { %1254 = vmatprep.subr.mxu0 %v1008_v51  ;;  %1287 = vmatprep.subr.mxu1 %v1028_v11 }
  0x3f   : > { %1255 = vmatpush3.msra.mxu0 %v1008_v51  ;;  %1288 = vmatpush3.msra.mxu1 %v1028_v11  ;;  %v1051_v51 = vld [vmem:[%s1824_s4 + $0x170] sm:$0xff] }
  0x40   : > { %1256 = vmatprep.subr.mxu0 %v1007_v52  ;;  %1289 = vmatprep.subr.mxu1 %v1027_v13 }
  0x41   : > { %1257 = vmatpush3.msra.mxu0 %v1007_v52  ;;  %1290 = vmatpush3.msra.mxu1 %v1027_v13 }
  0x42   : > { %1258 = vmatprep.subr.mxu0 %v1006_v53  ;;  %1291 = vmatprep.subr.mxu1 %v1026_v15 }
  0x43   : > { %1259 = vmatpush3.msra.mxu0 %v1006_v53  ;;  %1292 = vmatpush3.msra.mxu1 %v1026_v15 }
  0x44   : > { %1260 = vmatprep.subr.mxu0 %v1005_v54  ;;  %1293 = vmatprep.subr.mxu1 %v1025_v16 }
  0x45   : > { %1261 = vmatpush3.msra.mxu0 %v1005_v54  ;;  %1294 = vmatpush3.msra.mxu1 %v1025_v16 }
  0x46   : > { %1262 = vmatprep.subr.mxu0 %v1004_v55  ;;  %1295 = vmatprep.subr.mxu1 %v1024_v17 }
  0x47   : > { %1263 = vmatpush3.msra.mxu0 %v1004_v55  ;;  %1296 = vmatpush3.msra.mxu1 %v1024_v17  ;;  %v1054_v17 = vld [vmem:[%s1825_s5] ss:$0 sm:$0xff] }
  0x48   : > { %1264 = vmatprep.subr.mxu0 %v1003_v56  ;;  %1297 = vmatprep.subr.mxu1 %v1023_v19 }
  0x49   : > { %1265 = vmatpush3.msra.mxu0 %v1003_v56  ;;  %1298 = vmatpush3.msra.mxu1 %v1023_v19 }
  0x4a   : > { %1266 = vmatprep.subr.mxu0 %v1002_v57  ;;  %1299 = vmatprep.subr.mxu1 %v1022_v21 }
  0x4b   : > { %1267 = vmatpush3.msra.mxu0 %v1002_v57  ;;  %1300 = vmatpush3.msra.mxu1 %v1022_v21 }
  0x4c   : > { %1268 = vmatprep.subr.mxu0 %v1001_v59  ;;  %1301 = vmatprep.subr.mxu1 %v1021_v23 }
  0x4d   : > { %1269 = vmatpush3.msra.mxu0 %v1001_v59  ;;  %1302 = vmatpush3.msra.mxu1 %v1021_v23 }
  0x4e   : > { %1271 = vmatmul.mubr.msk.f32.vlgmr.msra.gmra.mxu0 %vm298_vm3, %v303_v60  ;;  %1308 = vmatprep.subr.mxu0 %v634_v63  ;;  %v1050_v60 = vld [vmem:[%s1824_s4 + $0x168] sm:$0xff] }
  0x4f   : > { %1309 = vmatpush3.msra.mxu0 %v634_v63  ;;  %1303 = vmatprep.subr.mxu1 %v1020_v25  ;;  %v1047_v63 = vld [vmem:[%s1824_s4 + $0x150] sm:$0xff] }
  0x50   : > { %1310 = vmatprep.subr.mxu0 %v633_v0  ;;  %1304 = vmatpush3.msra.mxu1 %v1020_v25 }
  0x51   : > { %1311 = vmatpush3.msra.mxu0 %v633_v0  ;;  %1343 = vmatprep.subr.mxu1 %v1052_v31  ;;  %v1046_v0 = vld [vmem:[%s1824_s4 + $0x148] sm:$0xff] }
  0x52   : > { %1312 = vmatprep.subr.mxu0 %v632_v2 }
  0x53   : > { %1313 = vmatpush3.msra.mxu0 %v632_v2  ;;  %v1044_v2 = vld [vmem:[%s1824_s4 + $0x138] sm:$0xff] }
  0x54   : > { %1314 = vmatprep.subr.mxu0 %v631_v4 }
  0x55   : > { %1315 = vmatpush3.msra.mxu0 %v631_v4  ;;  %v1042_v4 = vld [vmem:[%s1824_s4 + $0x128] sm:$0xff] }
  0x56   : > { %1316 = vmatprep.subr.mxu0 %v630_v6 }
  0x57   : > { %1317 = vmatpush3.msra.mxu0 %v630_v6  ;;  %v1040_v6 = vld [vmem:[%s1824_s4 + $0x118] sm:$0xff] }
  0x58   : > { %1318 = vmatprep.subr.mxu0 %v629_v8 }
  0x59   : > { %1319 = vmatpush3.msra.mxu0 %v629_v8  ;;  %v1038_v8 = vld [vmem:[%s1824_s4 + $0x108] sm:$0xff] }
  0x5a   : > { %1320 = vmatprep.subr.mxu0 %v628_v10 }
  0x5b   : > { %1321 = vmatpush3.msra.mxu0 %v628_v10 }
  0x5c   : > { %1322 = vmatprep.subr.mxu0 %v627_v12 }
  0x5d   : > { %1323 = vmatpush3.msra.mxu0 %v627_v12 }
  0x5e   : > { %1324 = vmatprep.subr.mxu0 %v626_v14 }
  0x5f   : > { %1325 = vmatpush3.msra.mxu0 %v626_v14 }
  0x60   : > { %1326 = vmatprep.subr.mxu0 %v625_v18 }
  0x61   : > { %1327 = vmatpush3.msra.mxu0 %v625_v18 }
  0x62   : > { %1328 = vmatprep.subr.mxu0 %v624_v20 }
  0x63   : > { %1329 = vmatpush3.msra.mxu0 %v624_v20 }
  0x64   : > { %1330 = vmatprep.subr.mxu0 %v623_v22 }
  0x65   : > { %1331 = vmatpush3.msra.mxu0 %v623_v22 }
  0x66   : > { %1332 = vmatprep.subr.mxu0 %v622_v24 }
  0x67   : > { %1333 = vmatpush3.msra.mxu0 %v622_v24 }
  0x68   : > { %1334 = vmatprep.subr.mxu0 %v621_v26 }
  0x69   : > { %1335 = vmatpush3.msra.mxu0 %v621_v26 }
  0x6a   : > { %1336 = vmatprep.subr.mxu0 %v620_v30 }
  0x6b   : > { %1337 = vmatpush3.msra.mxu0 %v620_v30 }
  0x6c   : > { %1338 = vmatprep.subr.mxu0 %v619_v32 }
  0x6d   : > { %1339 = vmatpush3.msra.mxu0 %v619_v32 }
  0xed   : > { %v1202_v33 = vpop.f32.mrf.mxu0 }
  0xee   : > { %v1237_v34 = vpop.f32.mrf.mxu1 }
  0xef   : > { %v409_v35 = vpop.f32.mrf.mxu0  ;;  %v490_v37 = vadd.f32 %v1237_v34, %v1202_v33 }
  0xf0   : > { %v484_v36 = vpop.f32.mrf.mxu1 }
  0xf1   : > { %v485_v40 = vadd.f32 %v484_v36, %v409_v35 }
 0x10e   : > { %v1272_v38 = vpop.f32.mrf.mxu0 }
 0x10f   : > { %v586_v41 = vadd.f32 %v1272_v38, %v490_v37 }
 0x110   : > { %v576_v43 = vpop.f32.mrf.mxu0 }
 0x111   : > { %v595_v44 = vmul.f32 %v1018_v39, %v586_v41  ;;  %v585_v45 = vadd.f32 %v576_v43, %v485_v40 }
 0x113   : > { %v604_v46 = vadd.f32 %v1019_v42, %v595_v44  ;;  %v594_v47 = vmul.f32 %v1018_v39, %v585_v45 }
 0x115   : > { %v1742_v48 = vmax.f32 %v604_v46, 0.0  ;;  %v603_v49 = vadd.f32 %v1019_v42, %v594_v47 }
 0x117   : > { %v605_v50 = vmax.f32 %v603_v49, 0.0  ;;  %v608_v53 = vrot.slane %v1742_v48, 7  ;;  %v614_v55 = vrot.slane %v1742_v48, 1 }
 0x119   : > { %1305 = vmatprep.mubr.f32.mxu1 %v605_v50  ;;  %v607_v52 = vrot.slane %v605_v50, 7  ;;  %v613_v54 = vrot.slane %v605_v50, 1 }
 0x11a   : > { %1306 = vmatmul.mubr.f32.vlgmr.msra.gmra.mxu1 %v1742_v48 }
 0x11b   : > { %1344 = vmatpush3.msra.mxu1 %v1052_v31  ;;  %v610_v56 = vsel %vm288_vm0, %v608_v53, %v607_v52  ;;  %v615_v57 = vsel %vm301_vm1, %v613_v54, %v614_v55  ;;  %v609_v59 = vsel %vm288_vm0, %v607_v52, %v608_v53  ;;  %v616_v10 = vsel %vm301_vm1, %v614_v55, %v613_v54 }
 0x11c   : > { %1345 = vmatprep.subr.mxu1 %v1051_v51  ;;  %1340 = vmatprep.mubr.msk.f32.mxu0 %vm284_vm2, %v610_v56 }
 0x11d   : > { %1346 = vmatpush3.msra.mxu1 %v1051_v51  ;;  %1375 = vmatprep.mubr.f32.mxu1 %v615_v57 }
 0x11e   : > { %1341 = vmatmul.mubr.f32.vlgmr.msra.gmra.mxu0 %v609_v59  ;;  %1347 = vmatprep.subr.mxu1 %v1050_v60 }
 0x11f   : > { %1348 = vmatpush3.msra.mxu1 %v1050_v60 }
 0x120   : > { %1349 = vmatprep.subr.mxu1 %v1049_v61 }
 0x121   : > { %1350 = vmatpush3.msra.mxu1 %v1049_v61 }
 0x122   : > { %1351 = vmatprep.subr.mxu1 %v1048_v62 }
 0x123   : > { %1352 = vmatpush3.msra.mxu1 %v1048_v62 }
 0x124   : > { %1353 = vmatprep.subr.mxu1 %v1047_v63 }
 0x125   : > { %1354 = vmatpush3.msra.mxu1 %v1047_v63 }
 0x126   : > { %1355 = vmatprep.subr.mxu1 %v1046_v0 }
 0x127   : > { %1356 = vmatpush3.msra.mxu1 %v1046_v0 }
 0x128   : > { %1357 = vmatprep.subr.mxu1 %v1045_v1 }
 0x129   : > { %1358 = vmatpush3.msra.mxu1 %v1045_v1 }
 0x12a   : > { %1359 = vmatprep.subr.mxu1 %v1044_v2 }
 0x12b   : > { %1360 = vmatpush3.msra.mxu1 %v1044_v2 }
 0x12c   : > { %1361 = vmatprep.subr.mxu1 %v1043_v3 }
 0x12d   : > { %1362 = vmatpush3.msra.mxu1 %v1043_v3 }
 0x12e   : > { %1363 = vmatprep.subr.mxu1 %v1042_v4 }
 0x12f   : > { %1364 = vmatpush3.msra.mxu1 %v1042_v4 }
 0x130   : > { %1365 = vmatprep.subr.mxu1 %v1041_v5 }
 0x131   : > { %1366 = vmatpush3.msra.mxu1 %v1041_v5 }
 0x132   : > { %1367 = vmatprep.subr.mxu1 %v1040_v6 }
 0x133   : > { %1368 = vmatpush3.msra.mxu1 %v1040_v6 }
 0x134   : > { %1369 = vmatprep.subr.mxu1 %v1039_v7 }
 0x135   : > { %1370 = vmatpush3.msra.mxu1 %v1039_v7 }
 0x136   : > { %1371 = vmatprep.subr.mxu1 %v1038_v8 }
 0x137   : > { %1372 = vmatpush3.msra.mxu1 %v1038_v8 }
 0x138   : > { %1373 = vmatprep.subr.mxu1 %v1037_v9 }
 0x139   : > { %1374 = vmatpush3.msra.mxu1 %v1037_v9 }
 0x13a   : > { %1376 = vmatmul.mubr.msk.f32.vlgmr.msra.gmra.mxu1 %vm298_vm3, %v616_v10 }
 0x1da   : > { %v1307_v11 = vpop.f32.mrf.mxu1 }
 0x1dc   : > { %v718_v13 = vpop.f32.mrf.mxu1 }
 0x1de   : > { %v1342_v12 = vpop.f32.mrf.mxu0 }
 0x1df   : > { %v799_v15 = vadd.f32 %v1342_v12, %v1307_v11 }
 0x1e0   : > { %v793_v14 = vpop.f32.mrf.mxu0 }
 0x1e1   : > { %v794_v18 = vadd.f32 %v793_v14, %v718_v13 }
 0x1fa   : > { %v1377_v16 = vpop.f32.mrf.mxu1 }
 0x1fb   : > { %v895_v19 = vadd.f32 %v1377_v16, %v799_v15 }
 0x1fc   : > { %v885_v20 = vpop.f32.mrf.mxu1 }
 0x1fd   : > { %v904_v58 = vmul.f32 %v1054_v17, %v895_v19  ;;  %v894_v21 = vadd.f32 %v885_v20, %v794_v18 }
 0x1ff   : > { %v913_v22 = vadd.f32 %v1055_v29, %v904_v58  ;;  %v903_v23 = vmul.f32 %v1054_v17, %v894_v21 }
 0x201   : > { %v915_v24 = vadd.f32 %v913_v22, %v1534_v28  ;;  %v912_v25 = vadd.f32 %v1055_v29, %v903_v23 }
 0x203   : > { %v917_v26 = vmax.f32 %v915_v24, 0.0  ;;  %v914_v30 = vadd.f32 %v912_v25, %v1532_v27 }
 0x205   : > { %919 = vst [vmem:[%s278_s30 + $0x8] sm:$0xff] %v917_v26  ;;  %v916_v31 = vmax.f32 %v914_v30, 0.0 }
 0x207   : > { %918 = vst [vmem:[%s278_s30] sm:$0xff] %v916_v31 }
 0x208 PF: > { %s17_s24 = sadd.s32 1, %s1392_s24  }
 0x209   : > { %p14_p4 = scmp.ge.s32.totalorder %s17_s24, 4  }
 0x20b   :  { %16 = sbr.rel (!%p14_p4) target bundleno = 1 (0x1), region = 82 }

</bundles_post_ra>
